<compile_context>
chip_gen: v7x
topology: tpu7x:2x2x1
jax: 0.10.0
libtpu: 0.0.40
codegen_flags: <defaults>
</compile_context>

<pallas_src>
import functools

import numpy as np
import jax
import jax.numpy as jnp
from jax.experimental import pallas as pl
from jax.experimental.pallas import tpu as pltpu

IMG_FEAT = 64 * 16 * 16  # 16384


# ----------------------------------------------------------------------------
# pltpu.roll shift-convention probe (documented behaviour == jnp.roll)
# ----------------------------------------------------------------------------
def _roll_probe_kernel(x_ref, o_ref):
    o_ref[...] = pltpu.roll(x_ref[...], 1, axis=1)


def _detect_roll_sign():
    """Return sgn such that pltpu.roll(x, sgn*k, axis)[i] == x[(i + k) % n]."""
    try:
        x = jnp.tile(jnp.arange(128, dtype=jnp.float32), (8, 1))
        y = pl.pallas_call(
            _roll_probe_kernel,
            out_shape=jax.ShapeDtypeStruct((8, 128), jnp.float32))(x)
        # jnp.roll convention: y[0,0] == 127 ; opposite convention: y[0,0] == 1
        return -1 if float(y[0, 0]) > 64.0 else 1
    except Exception:
        return -1  # fall back to the documented jnp.roll convention


def _roll(x, shift, axis):
    n = x.shape[axis]
    s = shift % n
    return pltpu.roll(x, s, axis=axis) if s else x


# ----------------------------------------------------------------------------
# The single fused kernel (one grid step = one batch element)
# ----------------------------------------------------------------------------
def _fused_kernel(x1_ref, sen_ref, w1c_ref, b1_ref, w2t_ref, b2_ref,
                  wm1_ref, bm1_ref, wm2_ref, bm2_ref,
                  wcx_ref, wcs_ref, bc_ref, out_ref, *, roll_sign):
    f32 = jnp.float32
    bf16 = jnp.bfloat16
    sgn = roll_sign  # _roll(x, sgn*k, axis)[i] == x[(i + k) % n]

    # ---- conv1 (1->32) + bias + ReLU + 2x2 maxpool ---------------------------
    # One (1024,16)x(16,128) bf16 matmul over the 16 stride-2 taps; the 4 pool
    # phases live in 32-lane blocks of the output.  Phase max via 2 lane rolls.
    z = jnp.dot(x1_ref[...], w1c_ref[...], preferred_element_type=f32)  # (1024,128)
    z = jnp.maximum(z, _roll(z, 64, 1))
    z = jnp.maximum(z, _roll(z, 32, 1))
    p1 = jnp.maximum(z[:, :32] + b1_ref[...], 0.0)    # (1024,32), rows = h*32 + w

    # ---- conv2 (32->64) + bias + ReLU ----------------------------------------
    # 9 accumulating K=32 bf16 matmuls; each tap is p1 rolled along its rows
    # (XLU) and edge-masked (VPU).  No im2col scratch, no concatenate.
    row = jax.lax.broadcasted_iota(jnp.int32, (1024, 1), 0)
    col = row % 32
    acc = None
    for sy in (-1, 0, 1):
        base = _roll(p1, sgn * 32 * sy, 0)
        hmask = None
        if sy == -1:
            hmask = row >= 32
        elif sy == 1:
            hmask = row < 992
        for sx in (-1, 0, 1):
            tap = _roll(base, sgn * sx, 0)
            m = hmask
            if sx == -1:
                wm = col >= 1
                m = wm if m is None else (m & wm)
            elif sx == 1:
                wm = col <= 30
                m = wm if m is None else (m & wm)
            if m is not None:
                tap = jnp.where(m, tap, 0.0)
            t = (sy + 1) * 3 + (sx + 1)
            d = jnp.dot(tap.astype(bf16), w2t_ref[t], preferred_element_type=f32)
            acc = d if acc is None else acc + d
    o2 = jnp.maximum(acc + b2_ref[...], 0.0)            # (1024, 64)

    # ---- 2x2 maxpool of conv2 -------------------------------------------------
    # W direction: one roll+max (valid at even w; odd-w columns are zeroed in
    # the classifier weights).  H direction: free group-axis max.
    o2w = jnp.maximum(o2, _roll(o2, sgn * 1, 0))         # row r -> max(r, r+1)
    o2p = jnp.max(o2w.reshape(16, 2, 32, 64), axis=1)    # (16, 32, 64)

    # ---- sensor MLP 4 -> 16 -> 32 ---------------------------------------------
    hid = jnp.maximum(jnp.dot(sen_ref[...], wm1_ref[...],
                              preferred_element_type=f32) + bm1_ref[...], 0.0)
    s = jnp.dot(hid, wm2_ref[...], preferred_element_type=f32) + bm2_ref[...]

    # ---- classifier ------------------------------------------------------------
    # sensor part + bias via a lane-padded (1,128) matmul; image part as one
    # exact-f32 multiply-reduce against trace-time repacked (odd-w-zeroed) weights.
    out_vec = jnp.dot(s, wcs_ref[...], preferred_element_type=f32) + bc_ref[...]
    prod = o2p[None] * wcx_ref[...]                      # (3, 16, 32, 64)
    t1 = jnp.sum(prod, axis=1)                           # (3, 32, 64)
    t2 = jnp.sum(t1, axis=1)                             # (3, 64)
    img_part = jnp.sum(t2, axis=1, keepdims=True)        # (3, 1)
    lane = jax.lax.broadcasted_iota(jnp.int32, (3, 128), 1)
    cls = jax.lax.broadcasted_iota(jnp.int32, (3, 128), 0)
    img_vec = jnp.sum(jnp.where(lane == cls, img_part, 0.0), axis=0, keepdims=True)
    out_ref[...] = out_vec + img_vec                      # (1, 128)


# ----------------------------------------------------------------------------
# Forward pass: tiny input prep + trace-time weight repacking + one pallas_call
# ----------------------------------------------------------------------------
def fusion_lite_cnn_forward(params, img_nchw, sensors, *, roll_sign=-1):
    f32 = jnp.float32
    bf16 = jnp.bfloat16
    B = img_nchw.shape[0]

    # input prep (small, XLA): pad and pre-slice the 16 stride-2 conv1 taps
    xpad = jnp.pad(img_nchw[:, 0].astype(f32), ((0, 0), (1, 1), (1, 1)))  # (B,66,66)
    slabs = [xpad[:, r::2, c::2][:, :32, :32]
             for r in range(4) for c in range(4)]
    x1lhs = jnp.stack(slabs, axis=-1).reshape(B, 1024, 16).astype(bf16)

    # trace-time weight repacking
    w1hw = jnp.transpose(params['conv1_w'][:, 0], (1, 2, 0))               # (3,3,32)
    phases = [jnp.zeros((4, 4, 32), f32).at[a:a + 3, b:b + 3, :].set(w1hw)
              .reshape(16, 32) for a in range(2) for b in range(2)]
    w1c = jnp.concatenate(phases, axis=1).astype(bf16)                     # (16,128)
    w2t = jnp.transpose(params['conv2_w'], (2, 3, 1, 0)).reshape(9, 32, 64).astype(bf16)
    wc = params['cls_w']                                                   # (3, 16416)
    wci = wc[:, :IMG_FEAT].reshape(3, 64, 16, 16).transpose(0, 2, 3, 1)    # (3,16,16,64)
    wcx = jnp.zeros((3, 16, 32, 64), f32).at[:, :, 0::2, :].set(wci)       # odd w -> 0
    wcs = jnp.zeros((32, 128), f32).at[:, :3].set(wc[:, IMG_FEAT:].T)
    bcp = jnp.zeros((1, 128), f32).at[0, :3].set(params['cls_b'])

    args = (
        x1lhs,
        sensors.astype(f32).reshape(B, 1, 4),
        w1c,
        params['conv1_b'].reshape(1, 32).astype(f32),
        w2t,
        params['conv2_b'].reshape(1, 64).astype(f32),
        params['mlp1_w'].T.astype(f32),
        params['mlp1_b'].reshape(1, 16).astype(f32),
        params['mlp2_w'].T.astype(f32),
        params['mlp2_b'].reshape(1, 32).astype(f32),
        wcx, wcs, bcp,
    )

    def batch_spec(shape):
        nd = len(shape)
        return pl.BlockSpec((None,) + tuple(shape[1:]),
                            lambda b: (b,) + (0,) * (nd - 1))

    def const_spec(shape):
        nd = len(shape)
        return pl.BlockSpec(tuple(shape), lambda b: (0,) * nd)

    in_specs = ([batch_spec(args[0].shape), batch_spec(args[1].shape)]
                + [const_spec(a.shape) for a in args[2:]])

    # grid=(B,): with B=2 both v7x TensorCores get one image each; per-image
    # batch blocking (Bblk>1) would leave a core idle for this batch size.
    out = pl.pallas_call(
        functools.partial(_fused_kernel, roll_sign=roll_sign),
        grid=(B,),
        in_specs=in_specs,
        out_specs=pl.BlockSpec((None, 1, 128), lambda b: (b, 0, 0)),
        out_shape=jax.ShapeDtypeStruct((B, 1, 128), f32),
        compiler_params=pltpu.CompilerParams(
            dimension_semantics=("parallel",),
            vmem_limit_bytes=32 * 1024 * 1024),
    )(*args)
    return out[:, 0, :3]


# ----------------------------------------------------------------------------
# Deterministic parameter init (PyTorch-style shapes + U(-1/sqrt(fan_in), ...))
# ----------------------------------------------------------------------------
def init_params(key):
    def uniform(k, shape, fan_in):
        bound = 1.0 / np.sqrt(fan_in)
        return jax.random.uniform(k, shape, jnp.float32, -bound, bound)

    ks = jax.random.split(key, 10)
    return {
        'conv1_w': uniform(ks[0], (32, 1, 3, 3), 1 * 9),
        'conv1_b': uniform(ks[1], (32,), 1 * 9),
        'conv2_w': uniform(ks[2], (64, 32, 3, 3), 32 * 9),
        'conv2_b': uniform(ks[3], (64,), 32 * 9),
        'mlp1_w': uniform(ks[4], (16, 4), 4),
        'mlp1_b': uniform(ks[5], (16,), 4),
        'mlp2_w': uniform(ks[6], (32, 16), 16),
        'mlp2_b': uniform(ks[7], (32,), 16),
        'cls_w': uniform(ks[8], (3, IMG_FEAT + 32), IMG_FEAT + 32),
        'cls_b': uniform(ks[9], (3,), IMG_FEAT + 32),
    }


# ----------------------------------------------------------------------------
# Pure-JAX reference (mirrors the PyTorch forward) for a correctness check
# ----------------------------------------------------------------------------
def reference_forward(params, img_nchw, sensors):
    hp = jax.lax.Precision.HIGHEST

    def conv(x, w, b):
        dn = jax.lax.conv_dimension_numbers(x.shape, w.shape, ('NCHW', 'OIHW', 'NCHW'))
        y = jax.lax.conv_general_dilated(x, w, (1, 1), [(1, 1), (1, 1)],
                                         dimension_numbers=dn, precision=hp)
        return jax.nn.relu(y + b[None, :, None, None])

    def pool(x):
        return jax.lax.reduce_window(x, -jnp.inf, jax.lax.max,
                                     (1, 1, 2, 2), (1, 1, 2, 2), 'VALID')

    x = pool(conv(img_nchw, params['conv1_w'], params['conv1_b']))
    x = pool(conv(x, params['conv2_w'], params['conv2_b']))
    img_feat = x.reshape(x.shape[0], -1)
    h = jax.nn.relu(jnp.dot(sensors, params['mlp1_w'].T, precision=hp) + params['mlp1_b'])
    s = jnp.dot(h, params['mlp2_w'].T, precision=hp) + params['mlp2_b']
    feat = jnp.concatenate([img_feat, s], axis=1)
    return jnp.dot(feat, params['cls_w'].T, precision=hp) + params['cls_b']


if __name__ == "__main__":
    key = jax.random.PRNGKey(0)
    pkey, ikey, skey = jax.random.split(key, 3)
    params = init_params(pkey)

    # Spatial size 64x64 is fixed by the classifier's 64*16*16 input features.
    img = jax.random.normal(ikey, (2, 1, 64, 64), jnp.float32)   # NCHW like PyTorch
    sensors = jax.random.normal(skey, (2, 4), jnp.float32)

    roll_sign = _detect_roll_sign()
    forward = jax.jit(functools.partial(fusion_lite_cnn_forward, roll_sign=roll_sign))
    out = jax.block_until_ready(forward(params, img, sensors))
    assert out.shape == (2, 3)

    ref = np.asarray(reference_forward(params, img, sensors))
    if not np.allclose(np.asarray(out), ref, rtol=1e-2, atol=1e-2):
        raise SystemExit("mismatch vs reference, max abs diff = %g"
                         % float(np.max(np.abs(np.asarray(out) - ref))))
    print("KERNEL_OK")
</pallas_src>

<mosaic_0001>
module attributes {stable_mosaic.version = 11 : i64} {
  func.func @_roll_probe_kernel(%arg0: memref<8x128xf32, #tpu.memory_space<vmem>>, %arg1: memref<8x128xf32, #tpu.memory_space<vmem>>) attributes {dimension_semantics = [], scalar_prefetch = 0 : i64, scratch_operands = 0 : i64, tpu.core_type = #tpu.core_type<tc>} {
    %c0 = arith.constant 0 : index
    %c0_0 = arith.constant 0 : index
    %0 = vector.load %arg0[%c0, %c0_0] : memref<8x128xf32, #tpu.memory_space<vmem>>, vector<8x128xf32>
    %c1_i32 = arith.constant 1 : i32
    %1 = tpu.dynamic_rotate %0 by %c1_i32 dim 1 : vector<8x128xf32>, i32 -> vector<8x128xf32>
    %c0_1 = arith.constant 0 : index
    %c0_2 = arith.constant 0 : index
    %2 = vector.load %arg1[%c0_1, %c0_2] : memref<8x128xf32, #tpu.memory_space<vmem>>, vector<8x128xf32>
    tpu.vector_store %arg1[%c0_1, %c0_2], %1 {strides = array<i32>} : memref<8x128xf32, #tpu.memory_space<vmem>>, vector<8x128xf32>,
    return
  }
}

module attributes {stable_mosaic.version = 11 : i64} {
  func.func @_fused_kernel(%arg0: i32, %arg1: memref<1x1024x16xbf16, #tpu.memory_space<vmem>>, %arg2: memref<1x1x4xf32, #tpu.memory_space<vmem>>, %arg3: memref<16x128xbf16, #tpu.memory_space<vmem>>, %arg4: memref<1x32xf32, #tpu.memory_space<vmem>>, %arg5: memref<9x32x64xbf16, #tpu.memory_space<vmem>>, %arg6: memref<1x64xf32, #tpu.memory_space<vmem>>, %arg7: memref<4x16xf32, #tpu.memory_space<vmem>>, %arg8: memref<1x16xf32, #tpu.memory_space<vmem>>, %arg9: memref<16x32xf32, #tpu.memory_space<vmem>>, %arg10: memref<1x32xf32, #tpu.memory_space<vmem>>, %arg11: memref<3x16x32x64xf32, #tpu.memory_space<vmem>>, %arg12: memref<32x128xf32, #tpu.memory_space<vmem>>, %arg13: memref<1x128xf32, #tpu.memory_space<vmem>>, %arg14: memref<1x1x128xf32, #tpu.memory_space<vmem>>) attributes {dimension_semantics = [#tpu.dimension_semantics<parallel>], iteration_bounds = array<i64: 2>, scalar_prefetch = 0 : i64, scratch_operands = 0 : i64, tpu.core_type = #tpu.core_type<tc>, window_params = [{transform_indices = @transform_0, window_bounds = array<i64: 1, 1024, 16>}, {transform_indices = @transform_1, window_bounds = array<i64: 1, 1, 4>}, {pipeline_mode = #tpu.pipeline_mode<synchronous>, transform_indices = @transform_2, window_bounds = array<i64: 16, 128>}, {pipeline_mode = #tpu.pipeline_mode<synchronous>, transform_indices = @transform_3, window_bounds = array<i64: 1, 32>}, {pipeline_mode = #tpu.pipeline_mode<synchronous>, transform_indices = @transform_4, window_bounds = array<i64: 9, 32, 64>}, {pipeline_mode = #tpu.pipeline_mode<synchronous>, transform_indices = @transform_5, window_bounds = array<i64: 1, 64>}, {pipeline_mode = #tpu.pipeline_mode<synchronous>, transform_indices = @transform_6, window_bounds = array<i64: 4, 16>}, {pipeline_mode = #tpu.pipeline_mode<synchronous>, transform_indices = @transform_7, window_bounds = array<i64: 1, 16>}, {pipeline_mode = #tpu.pipeline_mode<synchronous>, transform_indices = @transform_8, window_bounds = array<i64: 16, 32>}, {pipeline_mode = #tpu.pipeline_mode<synchronous>, transform_indices = @transform_9, window_bounds = array<i64: 1, 32>}, {pipeline_mode = #tpu.pipeline_mode<synchronous>, transform_indices = @transform_10, window_bounds = array<i64: 3, 16, 32, 64>}, {pipeline_mode = #tpu.pipeline_mode<synchronous>, transform_indices = @transform_11, window_bounds = array<i64: 32, 128>}, {pipeline_mode = #tpu.pipeline_mode<synchronous>, transform_indices = @transform_12, window_bounds = array<i64: 1, 128>}, {transform_indices = @transform_13, window_bounds = array<i64: 1, 1, 128>}]} {
    %c0 = arith.constant 0 : index
    %c0_0 = arith.constant 0 : index
    %c0_1 = arith.constant 0 : index
    %0 = vector.load %arg1[%c0, %c0_0, %c0_1] : memref<1x1024x16xbf16, #tpu.memory_space<vmem>>, vector<1x1024x16xbf16>
    %1 = vector.shape_cast %0 : vector<1x1024x16xbf16> to vector<1024x16xbf16>
    %c0_2 = arith.constant 0 : index
    %c0_3 = arith.constant 0 : index
    %2 = vector.load %arg3[%c0_2, %c0_3] : memref<16x128xbf16, #tpu.memory_space<vmem>>, vector<16x128xbf16>
    %cst = arith.constant dense<0.000000e+00> : vector<1024x128xf32>
    %3 = tpu.matmul %1, %2, %cst {dimension_numbers = #tpu.dot_dimension_numbers<[1], [0], [0], [1], [0, 0, 1, 1], [], []>} : vector<1024x16xbf16>, vector<16x128xbf16>, vector<1024x128xf32> -> vector<1024x128xf32>
    %c64_i32 = arith.constant 64 : i32
    %4 = tpu.dynamic_rotate %3 by %c64_i32 dim 1 : vector<1024x128xf32>, i32 -> vector<1024x128xf32>
    %5 = arith.maximumf %3, %4 : vector<1024x128xf32>
    %c32_i32 = arith.constant 32 : i32
    %6 = tpu.dynamic_rotate %5 by %c32_i32 dim 1 : vector<1024x128xf32>, i32 -> vector<1024x128xf32>
    %7 = arith.maximumf %5, %6 : vector<1024x128xf32>
    %8 = vector.extract_strided_slice %7 {offsets = [0, 0], sizes = [1024, 32], strides = [1, 1]} : vector<1024x128xf32> to vector<1024x32xf32>
    %c0_4 = arith.constant 0 : index
    %c0_5 = arith.constant 0 : index
    %9 = vector.load %arg4[%c0_4, %c0_5] : memref<1x32xf32, #tpu.memory_space<vmem>>, vector<1x32xf32>
    %10 = vector.broadcast %9 : vector<1x32xf32> to vector<1024x32xf32>
    %11 = arith.addf %8, %10 : vector<1024x32xf32>
    %cst_6 = arith.constant 0.000000e+00 : f32
    %12 = vector.broadcast %cst_6 : f32 to vector<1024x32xf32>
    %13 = arith.maximumf %11, %12 : vector<1024x32xf32>
    %14 = tpu.iota {dimensions = array<i32: 0>} : vector<1024x1xi32>
    %c32_i32_7 = arith.constant 32 : i32
    %c0_i32 = arith.constant 0 : i32
    %15 = arith.cmpi eq, %c32_i32_7, %c0_i32 : i32
    %c1_i32 = arith.constant 1 : i32
    %16 = arith.select %15, %c1_i32, %c32_i32_7 : i32
    %17 = vector.broadcast %16 : i32 to vector<1024x1xi32>
    %18 = arith.remsi %14, %17 : vector<1024x1xi32>
    %c0_i32_8 = arith.constant 0 : i32
    %19 = vector.broadcast %c0_i32_8 : i32 to vector<1024x1xi32>
    %20 = arith.cmpi ne, %18, %19 : vector<1024x1xi32>
    %c0_i32_9 = arith.constant 0 : i32
    %21 = vector.broadcast %c0_i32_9 : i32 to vector<1024x1xi32>
    %22 = arith.cmpi slt, %18, %21 : vector<1024x1xi32>
    %c0_i32_10 = arith.constant 0 : i32
    %23 = arith.cmpi slt, %16, %c0_i32_10 : i32
    %24 = vector.broadcast %23 : i1 to vector<1024x1xi1>
    %25 = vector.broadcast %24 : vector<1024x1xi1> to vector<1024x1xi1>
    %26 = arith.xori %22, %25 : vector<1024x1xi1>
    %27 = arith.andi %26, %20 : vector<1024x1xi1>
    %28 = vector.broadcast %16 : i32 to vector<1024x1xi32>
    %29 = arith.addi %18, %28 : vector<1024x1xi32>
    %30 = arith.select %27, %29, %18 : vector<1024x1xi1>, vector<1024x1xi32>
    %c32_i32_11 = arith.constant 32 : i32
    %31 = tpu.dynamic_rotate %13 by %c32_i32_11 dim 0 : vector<1024x32xf32>, i32 -> vector<1024x32xf32>
    %c32_i32_12 = arith.constant 32 : i32
    %32 = vector.broadcast %c32_i32_12 : i32 to vector<1024x1xi32>
    %33 = arith.cmpi sge, %14, %32 : vector<1024x1xi32>
    %c1_i32_13 = arith.constant 1 : i32
    %34 = tpu.dynamic_rotate %31 by %c1_i32_13 dim 0 : vector<1024x32xf32>, i32 -> vector<1024x32xf32>
    %c1_i32_14 = arith.constant 1 : i32
    %35 = vector.broadcast %c1_i32_14 : i32 to vector<1024x1xi32>
    %36 = arith.cmpi sge, %30, %35 : vector<1024x1xi32>
    %37 = arith.andi %33, %36 : vector<1024x1xi1>
    %cst_15 = arith.constant 0.000000e+00 : f32
    %38 = vector.shape_cast %37 : vector<1024x1xi1> to vector<1024x1xi1>
    %39 = vector.broadcast %38 : vector<1024x1xi1> to vector<1024x32xi1>
    %40 = vector.broadcast %cst_15 : f32 to vector<1024x32xf32>
    %41 = arith.select %39, %34, %40 : vector<1024x32xi1>, vector<1024x32xf32>
    %42 = arith.truncf %41 : vector<1024x32xf32> to vector<1024x32xbf16>
    %c0_16 = arith.constant 0 : index
    %c0_17 = arith.constant 0 : index
    %c0_18 = arith.constant 0 : index
    %43 = vector.load %arg5[%c0_16, %c0_17, %c0_18] : memref<9x32x64xbf16, #tpu.memory_space<vmem>>, vector<1x32x64xbf16>
    %44 = vector.shape_cast %43 : vector<1x32x64xbf16> to vector<32x64xbf16>
    %cst_19 = arith.constant dense<0.000000e+00> : vector<1024x64xf32>
    %45 = tpu.matmul %42, %44, %cst_19 {dimension_numbers = #tpu.dot_dimension_numbers<[1], [0], [0], [1], [0, 0, 1, 1], [], []>} : vector<1024x32xbf16>, vector<32x64xbf16>, vector<1024x64xf32> -> vector<1024x64xf32>
    %cst_20 = arith.constant 0.000000e+00 : f32
    %46 = vector.shape_cast %33 : vector<1024x1xi1> to vector<1024x1xi1>
    %47 = vector.broadcast %46 : vector<1024x1xi1> to vector<1024x32xi1>
    %48 = vector.broadcast %cst_20 : f32 to vector<1024x32xf32>
    %49 = arith.select %47, %31, %48 : vector<1024x32xi1>, vector<1024x32xf32>
    %50 = arith.truncf %49 : vector<1024x32xf32> to vector<1024x32xbf16>
    %c1 = arith.constant 1 : index
    %c0_21 = arith.constant 0 : index
    %c0_22 = arith.constant 0 : index
    %51 = vector.load %arg5[%c1, %c0_21, %c0_22] : memref<9x32x64xbf16, #tpu.memory_space<vmem>>, vector<1x32x64xbf16>
    %52 = vector.shape_cast %51 : vector<1x32x64xbf16> to vector<32x64xbf16>
    %cst_23 = arith.constant dense<0.000000e+00> : vector<1024x64xf32>
    %53 = tpu.matmul %50, %52, %cst_23 {dimension_numbers = #tpu.dot_dimension_numbers<[1], [0], [0], [1], [0, 0, 1, 1], [], []>} : vector<1024x32xbf16>, vector<32x64xbf16>, vector<1024x64xf32> -> vector<1024x64xf32>
    %54 = arith.addf %45, %53 : vector<1024x64xf32>
    %c1023_i32 = arith.constant 1023 : i32
    %55 = tpu.dynamic_rotate %31 by %c1023_i32 dim 0 : vector<1024x32xf32>, i32 -> vector<1024x32xf32>
    %c30_i32 = arith.constant 30 : i32
    %56 = vector.broadcast %c30_i32 : i32 to vector<1024x1xi32>
    %57 = arith.cmpi sle, %30, %56 : vector<1024x1xi32>
    %58 = arith.andi %33, %57 : vector<1024x1xi1>
    %cst_24 = arith.constant 0.000000e+00 : f32
    %59 = vector.shape_cast %58 : vector<1024x1xi1> to vector<1024x1xi1>
    %60 = vector.broadcast %59 : vector<1024x1xi1> to vector<1024x32xi1>
    %61 = vector.broadcast %cst_24 : f32 to vector<1024x32xf32>
    %62 = arith.select %60, %55, %61 : vector<1024x32xi1>, vector<1024x32xf32>
    %63 = arith.truncf %62 : vector<1024x32xf32> to vector<1024x32xbf16>
    %c2 = arith.constant 2 : index
    %c0_25 = arith.constant 0 : index
    %c0_26 = arith.constant 0 : index
    %64 = vector.load %arg5[%c2, %c0_25, %c0_26] : memref<9x32x64xbf16, #tpu.memory_space<vmem>>, vector<1x32x64xbf16>
    %65 = vector.shape_cast %64 : vector<1x32x64xbf16> to vector<32x64xbf16>
    %cst_27 = arith.constant dense<0.000000e+00> : vector<1024x64xf32>
    %66 = tpu.matmul %63, %65, %cst_27 {dimension_numbers = #tpu.dot_dimension_numbers<[1], [0], [0], [1], [0, 0, 1, 1], [], []>} : vector<1024x32xbf16>, vector<32x64xbf16>, vector<1024x64xf32> -> vector<1024x64xf32>
    %67 = arith.addf %54, %66 : vector<1024x64xf32>
    %c1_i32_28 = arith.constant 1 : i32
    %68 = tpu.dynamic_rotate %13 by %c1_i32_28 dim 0 : vector<1024x32xf32>, i32 -> vector<1024x32xf32>
    %c1_i32_29 = arith.constant 1 : i32
    %69 = vector.broadcast %c1_i32_29 : i32 to vector<1024x1xi32>
    %70 = arith.cmpi sge, %30, %69 : vector<1024x1xi32>
    %cst_30 = arith.constant 0.000000e+00 : f32
    %71 = vector.shape_cast %70 : vector<1024x1xi1> to vector<1024x1xi1>
    %72 = vector.broadcast %71 : vector<1024x1xi1> to vector<1024x32xi1>
    %73 = vector.broadcast %cst_30 : f32 to vector<1024x32xf32>
    %74 = arith.select %72, %68, %73 : vector<1024x32xi1>, vector<1024x32xf32>
    %75 = arith.truncf %74 : vector<1024x32xf32> to vector<1024x32xbf16>
    %c3 = arith.constant 3 : index
    %c0_31 = arith.constant 0 : index
    %c0_32 = arith.constant 0 : index
    %76 = vector.load %arg5[%c3, %c0_31, %c0_32] : memref<9x32x64xbf16, #tpu.memory_space<vmem>>, vector<1x32x64xbf16>
    %77 = vector.shape_cast %76 : vector<1x32x64xbf16> to vector<32x64xbf16>
    %cst_33 = arith.constant dense<0.000000e+00> : vector<1024x64xf32>
    %78 = tpu.matmul %75, %77, %cst_33 {dimension_numbers = #tpu.dot_dimension_numbers<[1], [0], [0], [1], [0, 0, 1, 1], [], []>} : vector<1024x32xbf16>, vector<32x64xbf16>, vector<1024x64xf32> -> vector<1024x64xf32>
    %79 = arith.addf %67, %78 : vector<1024x64xf32>
    %80 = arith.truncf %13 : vector<1024x32xf32> to vector<1024x32xbf16>
    %c4 = arith.constant 4 : index
    %c0_34 = arith.constant 0 : index
    %c0_35 = arith.constant 0 : index
    %81 = vector.load %arg5[%c4, %c0_34, %c0_35] : memref<9x32x64xbf16, #tpu.memory_space<vmem>>, vector<1x32x64xbf16>
    %82 = vector.shape_cast %81 : vector<1x32x64xbf16> to vector<32x64xbf16>
    %cst_36 = arith.constant dense<0.000000e+00> : vector<1024x64xf32>
    %83 = tpu.matmul %80, %82, %cst_36 {dimension_numbers = #tpu.dot_dimension_numbers<[1], [0], [0], [1], [0, 0, 1, 1], [], []>} : vector<1024x32xbf16>, vector<32x64xbf16>, vector<1024x64xf32> -> vector<1024x64xf32>
    %84 = arith.addf %79, %83 : vector<1024x64xf32>
    %c1023_i32_37 = arith.constant 1023 : i32
    %85 = tpu.dynamic_rotate %13 by %c1023_i32_37 dim 0 : vector<1024x32xf32>, i32 -> vector<1024x32xf32>
    %c30_i32_38 = arith.constant 30 : i32
    %86 = vector.broadcast %c30_i32_38 : i32 to vector<1024x1xi32>
    %87 = arith.cmpi sle, %30, %86 : vector<1024x1xi32>
    %cst_39 = arith.constant 0.000000e+00 : f32
    %88 = vector.shape_cast %87 : vector<1024x1xi1> to vector<1024x1xi1>
    %89 = vector.broadcast %88 : vector<1024x1xi1> to vector<1024x32xi1>
    %90 = vector.broadcast %cst_39 : f32 to vector<1024x32xf32>
    %91 = arith.select %89, %85, %90 : vector<1024x32xi1>, vector<1024x32xf32>
    %92 = arith.truncf %91 : vector<1024x32xf32> to vector<1024x32xbf16>
    %c5 = arith.constant 5 : index
    %c0_40 = arith.constant 0 : index
    %c0_41 = arith.constant 0 : index
    %93 = vector.load %arg5[%c5, %c0_40, %c0_41] : memref<9x32x64xbf16, #tpu.memory_space<vmem>>, vector<1x32x64xbf16>
    %94 = vector.shape_cast %93 : vector<1x32x64xbf16> to vector<32x64xbf16>
    %cst_42 = arith.constant dense<0.000000e+00> : vector<1024x64xf32>
    %95 = tpu.matmul %92, %94, %cst_42 {dimension_numbers = #tpu.dot_dimension_numbers<[1], [0], [0], [1], [0, 0, 1, 1], [], []>} : vector<1024x32xbf16>, vector<32x64xbf16>, vector<1024x64xf32> -> vector<1024x64xf32>
    %96 = arith.addf %84, %95 : vector<1024x64xf32>
    %c992_i32 = arith.constant 992 : i32
    %97 = tpu.dynamic_rotate %13 by %c992_i32 dim 0 : vector<1024x32xf32>, i32 -> vector<1024x32xf32>
    %c992_i32_43 = arith.constant 992 : i32
    %98 = vector.broadcast %c992_i32_43 : i32 to vector<1024x1xi32>
    %99 = arith.cmpi slt, %14, %98 : vector<1024x1xi32>
    %c1_i32_44 = arith.constant 1 : i32
    %100 = tpu.dynamic_rotate %97 by %c1_i32_44 dim 0 : vector<1024x32xf32>, i32 -> vector<1024x32xf32>
    %c1_i32_45 = arith.constant 1 : i32
    %101 = vector.broadcast %c1_i32_45 : i32 to vector<1024x1xi32>
    %102 = arith.cmpi sge, %30, %101 : vector<1024x1xi32>
    %103 = arith.andi %99, %102 : vector<1024x1xi1>
    %cst_46 = arith.constant 0.000000e+00 : f32
    %104 = vector.shape_cast %103 : vector<1024x1xi1> to vector<1024x1xi1>
    %105 = vector.broadcast %104 : vector<1024x1xi1> to vector<1024x32xi1>
    %106 = vector.broadcast %cst_46 : f32 to vector<1024x32xf32>
    %107 = arith.select %105, %100, %106 : vector<1024x32xi1>, vector<1024x32xf32>
    %108 = arith.truncf %107 : vector<1024x32xf32> to vector<1024x32xbf16>
    %c6 = arith.constant 6 : index
    %c0_47 = arith.constant 0 : index
    %c0_48 = arith.constant 0 : index
    %109 = vector.load %arg5[%c6, %c0_47, %c0_48] : memref<9x32x64xbf16, #tpu.memory_space<vmem>>, vector<1x32x64xbf16>
    %110 = vector.shape_cast %109 : vector<1x32x64xbf16> to vector<32x64xbf16>
    %cst_49 = arith.constant dense<0.000000e+00> : vector<1024x64xf32>
    %111 = tpu.matmul %108, %110, %cst_49 {dimension_numbers = #tpu.dot_dimension_numbers<[1], [0], [0], [1], [0, 0, 1, 1], [], []>} : vector<1024x32xbf16>, vector<32x64xbf16>, vector<1024x64xf32> -> vector<1024x64xf32>
    %112 = arith.addf %96, %111 : vector<1024x64xf32>
    %cst_50 = arith.constant 0.000000e+00 : f32
    %113 = vector.shape_cast %99 : vector<1024x1xi1> to vector<1024x1xi1>
    %114 = vector.broadcast %113 : vector<1024x1xi1> to vector<1024x32xi1>
    %115 = vector.broadcast %cst_50 : f32 to vector<1024x32xf32>
    %116 = arith.select %114, %97, %115 : vector<1024x32xi1>, vector<1024x32xf32>
    %117 = arith.truncf %116 : vector<1024x32xf32> to vector<1024x32xbf16>
    %c7 = arith.constant 7 : index
    %c0_51 = arith.constant 0 : index
    %c0_52 = arith.constant 0 : index
    %118 = vector.load %arg5[%c7, %c0_51, %c0_52] : memref<9x32x64xbf16, #tpu.memory_space<vmem>>, vector<1x32x64xbf16>
    %119 = vector.shape_cast %118 : vector<1x32x64xbf16> to vector<32x64xbf16>
    %cst_53 = arith.constant dense<0.000000e+00> : vector<1024x64xf32>
    %120 = tpu.matmul %117, %119, %cst_53 {dimension_numbers = #tpu.dot_dimension_numbers<[1], [0], [0], [1], [0, 0, 1, 1], [], []>} : vector<1024x32xbf16>, vector<32x64xbf16>, vector<1024x64xf32> -> vector<1024x64xf32>
    %121 = arith.addf %112, %120 : vector<1024x64xf32>
    %c1023_i32_54 = arith.constant 1023 : i32
    %122 = tpu.dynamic_rotate %97 by %c1023_i32_54 dim 0 : vector<1024x32xf32>, i32 -> vector<1024x32xf32>
    %c30_i32_55 = arith.constant 30 : i32
    %123 = vector.broadcast %c30_i32_55 : i32 to vector<1024x1xi32>
    %124 = arith.cmpi sle, %30, %123 : vector<1024x1xi32>
    %125 = arith.andi %99, %124 : vector<1024x1xi1>
    %cst_56 = arith.constant 0.000000e+00 : f32
    %126 = vector.shape_cast %125 : vector<1024x1xi1> to vector<1024x1xi1>
    %127 = vector.broadcast %126 : vector<1024x1xi1> to vector<1024x32xi1>
    %128 = vector.broadcast %cst_56 : f32 to vector<1024x32xf32>
    %129 = arith.select %127, %122, %128 : vector<1024x32xi1>, vector<1024x32xf32>
    %130 = arith.truncf %129 : vector<1024x32xf32> to vector<1024x32xbf16>
    %c8 = arith.constant 8 : index
    %c0_57 = arith.constant 0 : index
    %c0_58 = arith.constant 0 : index
    %131 = vector.load %arg5[%c8, %c0_57, %c0_58] : memref<9x32x64xbf16, #tpu.memory_space<vmem>>, vector<1x32x64xbf16>
    %132 = vector.shape_cast %131 : vector<1x32x64xbf16> to vector<32x64xbf16>
    %cst_59 = arith.constant dense<0.000000e+00> : vector<1024x64xf32>
    %133 = tpu.matmul %130, %132, %cst_59 {dimension_numbers = #tpu.dot_dimension_numbers<[1], [0], [0], [1], [0, 0, 1, 1], [], []>} : vector<1024x32xbf16>, vector<32x64xbf16>, vector<1024x64xf32> -> vector<1024x64xf32>
    %134 = arith.addf %121, %133 : vector<1024x64xf32>
    %c0_60 = arith.constant 0 : index
    %c0_61 = arith.constant 0 : index
    %135 = vector.load %arg6[%c0_60, %c0_61] : memref<1x64xf32, #tpu.memory_space<vmem>>, vector<1x64xf32>
    %136 = vector.broadcast %135 : vector<1x64xf32> to vector<1024x64xf32>
    %137 = arith.addf %134, %136 : vector<1024x64xf32>
    %cst_62 = arith.constant 0.000000e+00 : f32
    %138 = vector.broadcast %cst_62 : f32 to vector<1024x64xf32>
    %139 = arith.maximumf %137, %138 : vector<1024x64xf32>
    %c1023_i32_63 = arith.constant 1023 : i32
    %140 = tpu.dynamic_rotate %139 by %c1023_i32_63 dim 0 : vector<1024x64xf32>, i32 -> vector<1024x64xf32>
    %141 = arith.maximumf %139, %140 : vector<1024x64xf32>
    %142 = vector.shape_cast %141 : vector<1024x64xf32> to vector<16x2x32x64xf32>
    %cst_64 = arith.constant dense<0xFF800000> : vector<16x32x64xf32>
    %143 = vector.multi_reduction <maximumf>, %142, %cst_64 [1] : vector<16x2x32x64xf32> to vector<16x32x64xf32>
    %c0_65 = arith.constant 0 : index
    %c0_66 = arith.constant 0 : index
    %c0_67 = arith.constant 0 : index
    %144 = vector.load %arg2[%c0_65, %c0_66, %c0_67] : memref<1x1x4xf32, #tpu.memory_space<vmem>>, vector<1x1x4xf32>
    %145 = vector.shape_cast %144 : vector<1x1x4xf32> to vector<1x4xf32>
    %c0_68 = arith.constant 0 : index
    %c0_69 = arith.constant 0 : index
    %146 = vector.load %arg7[%c0_68, %c0_69] : memref<4x16xf32, #tpu.memory_space<vmem>>, vector<4x16xf32>
    %cst_70 = arith.constant dense<0.000000e+00> : vector<1x16xf32>
    %147 = tpu.matmul %145, %146, %cst_70 {dimension_numbers = #tpu.dot_dimension_numbers<[1], [0], [0], [1], [0, 0, 1, 1], [], []>} : vector<1x4xf32>, vector<4x16xf32>, vector<1x16xf32> -> vector<1x16xf32>
    %c0_71 = arith.constant 0 : index
    %c0_72 = arith.constant 0 : index
    %148 = vector.load %arg8[%c0_71, %c0_72] : memref<1x16xf32, #tpu.memory_space<vmem>>, vector<1x16xf32>
    %149 = arith.addf %147, %148 : vector<1x16xf32>
    %cst_73 = arith.constant 0.000000e+00 : f32
    %150 = vector.broadcast %cst_73 : f32 to vector<1x16xf32>
    %151 = arith.maximumf %149, %150 : vector<1x16xf32>
    %c0_74 = arith.constant 0 : index
    %c0_75 = arith.constant 0 : index
    %152 = vector.load %arg9[%c0_74, %c0_75] : memref<16x32xf32, #tpu.memory_space<vmem>>, vector<16x32xf32>
    %cst_76 = arith.constant dense<0.000000e+00> : vector<1x32xf32>
    %153 = tpu.matmul %151, %152, %cst_76 {dimension_numbers = #tpu.dot_dimension_numbers<[1], [0], [0], [1], [0, 0, 1, 1], [], []>} : vector<1x16xf32>, vector<16x32xf32>, vector<1x32xf32> -> vector<1x32xf32>
    %c0_77 = arith.constant 0 : index
    %c0_78 = arith.constant 0 : index
    %154 = vector.load %arg10[%c0_77, %c0_78] : memref<1x32xf32, #tpu.memory_space<vmem>>, vector<1x32xf32>
    %155 = arith.addf %153, %154 : vector<1x32xf32>
    %c0_79 = arith.constant 0 : index
    %c0_80 = arith.constant 0 : index
    %156 = vector.load %arg12[%c0_79, %c0_80] : memref<32x128xf32, #tpu.memory_space<vmem>>, vector<32x128xf32>
    %cst_81 = arith.constant dense<0.000000e+00> : vector<1x128xf32>
    %157 = tpu.matmul %155, %156, %cst_81 {dimension_numbers = #tpu.dot_dimension_numbers<[1], [0], [0], [1], [0, 0, 1, 1], [], []>} : vector<1x32xf32>, vector<32x128xf32>, vector<1x128xf32> -> vector<1x128xf32>
    %c0_82 = arith.constant 0 : index
    %c0_83 = arith.constant 0 : index
    %158 = vector.load %arg13[%c0_82, %c0_83] : memref<1x128xf32, #tpu.memory_space<vmem>>, vector<1x128xf32>
    %159 = arith.addf %157, %158 : vector<1x128xf32>
    %160 = vector.shape_cast %143 : vector<16x32x64xf32> to vector<1x16x32x64xf32>
    %c0_84 = arith.constant 0 : index
    %c0_85 = arith.constant 0 : index
    %c0_86 = arith.constant 0 : index
    %c0_87 = arith.constant 0 : index
    %161 = vector.load %arg11[%c0_84, %c0_85, %c0_86, %c0_87] : memref<3x16x32x64xf32, #tpu.memory_space<vmem>>, vector<3x16x32x64xf32>
    %162 = vector.broadcast %160 : vector<1x16x32x64xf32> to vector<3x16x32x64xf32>
    %163 = arith.mulf %162, %161 : vector<3x16x32x64xf32>
    %cst_88 = arith.constant dense<0.000000e+00> : vector<3x32x64xf32>
    %164 = vector.multi_reduction <add>, %163, %cst_88 [1] : vector<3x16x32x64xf32> to vector<3x32x64xf32>
    %cst_89 = arith.constant dense<0.000000e+00> : vector<3x64xf32>
    %165 = vector.multi_reduction <add>, %164, %cst_89 [1] : vector<3x32x64xf32> to vector<3x64xf32>
    %cst_90 = arith.constant dense<0.000000e+00> : vector<3xf32>
    %166 = vector.multi_reduction <add>, %165, %cst_90 [1] : vector<3x64xf32> to vector<3xf32>
    %167 = vector.shape_cast %166 : vector<3xf32> to vector<3x1xf32>
    %168 = tpu.iota {dimensions = array<i32: 1>} : vector<3x128xi32>
    %169 = tpu.iota {dimensions = array<i32: 0>} : vector<3x128xi32>
    %170 = arith.cmpi eq, %168, %169 : vector<3x128xi32>
    %cst_91 = arith.constant 0.000000e+00 : f32
    %171 = vector.shape_cast %167 : vector<3x1xf32> to vector<3x1xf32>
    %172 = vector.broadcast %171 : vector<3x1xf32> to vector<3x128xf32>
    %173 = vector.broadcast %cst_91 : f32 to vector<3x128xf32>
    %174 = arith.select %170, %172, %173 : vector<3x128xi1>, vector<3x128xf32>
    %cst_92 = arith.constant dense<0.000000e+00> : vector<128xf32>
    %175 = vector.multi_reduction <add>, %174, %cst_92 [0] : vector<3x128xf32> to vector<128xf32>
    %176 = vector.shape_cast %175 : vector<128xf32> to vector<1x128xf32>
    %177 = arith.addf %159, %176 : vector<1x128xf32>
    %c0_93 = arith.constant 0 : index
    %c0_94 = arith.constant 0 : index
    %c0_95 = arith.constant 0 : index
    %178 = vector.load %arg14[%c0_93, %c0_94, %c0_95] : memref<1x1x128xf32, #tpu.memory_space<vmem>>, vector<1x1x128xf32>
    %179 = vector.shape_cast %178 : vector<1x1x128xf32> to vector<1x128xf32>
    %180 = vector.shape_cast %177 : vector<1x128xf32> to vector<1x1x128xf32>
    tpu.vector_store %arg14[%c0_93, %c0_94, %c0_95], %180 {strides = array<i32>} : memref<1x1x128xf32, #tpu.memory_space<vmem>>, vector<1x1x128xf32>,
    return
  }
  func.func @transform_0(%arg0: i32) -> (i32, i32, i32) {
    %c0_i32 = arith.constant 0 : i32
    %c0_i32_0 = arith.constant 0 : i32
    %c0_i32_1 = arith.constant 0 : i32
    return %arg0, %c0_i32, %c0_i32_0 : i32, i32, i32
  }
  func.func @transform_1(%arg0: i32) -> (i32, i32, i32) {
    %c0_i32 = arith.constant 0 : i32
    %c0_i32_0 = arith.constant 0 : i32
    %c0_i32_1 = arith.constant 0 : i32
    return %arg0, %c0_i32, %c0_i32_0 : i32, i32, i32
  }
  func.func @transform_2(%arg0: i32) -> (i32, i32) {
    %c0_i32 = arith.constant 0 : i32
    %c0_i32_0 = arith.constant 0 : i32
    %c0_i32_1 = arith.constant 0 : i32
    return %c0_i32, %c0_i32_0 : i32, i32
  }
  func.func @transform_3(%arg0: i32) -> (i32, i32) {
    %c0_i32 = arith.constant 0 : i32
    %c0_i32_0 = arith.constant 0 : i32
    %c0_i32_1 = arith.constant 0 : i32
    return %c0_i32, %c0_i32_0 : i32, i32
  }
  func.func @transform_4(%arg0: i32) -> (i32, i32, i32) {
    %c0_i32 = arith.constant 0 : i32
    %c0_i32_0 = arith.constant 0 : i32
    %c0_i32_1 = arith.constant 0 : i32
    %c0_i32_2 = arith.constant 0 : i32
    return %c0_i32, %c0_i32_0, %c0_i32_1 : i32, i32, i32
  }
  func.func @transform_5(%arg0: i32) -> (i32, i32) {
    %c0_i32 = arith.constant 0 : i32
    %c0_i32_0 = arith.constant 0 : i32
    %c0_i32_1 = arith.constant 0 : i32
    return %c0_i32, %c0_i32_0 : i32, i32
  }
  func.func @transform_6(%arg0: i32) -> (i32, i32) {
    %c0_i32 = arith.constant 0 : i32
    %c0_i32_0 = arith.constant 0 : i32
    %c0_i32_1 = arith.constant 0 : i32
    return %c0_i32, %c0_i32_0 : i32, i32
  }
  func.func @transform_7(%arg0: i32) -> (i32, i32) {
    %c0_i32 = arith.constant 0 : i32
    %c0_i32_0 = arith.constant 0 : i32
    %c0_i32_1 = arith.constant 0 : i32
    return %c0_i32, %c0_i32_0 : i32, i32
  }
  func.func @transform_8(%arg0: i32) -> (i32, i32) {
    %c0_i32 = arith.constant 0 : i32
    %c0_i32_0 = arith.constant 0 : i32
    %c0_i32_1 = arith.constant 0 : i32
    return %c0_i32, %c0_i32_0 : i32, i32
  }
  func.func @transform_9(%arg0: i32) -> (i32, i32) {
    %c0_i32 = arith.constant 0 : i32
    %c0_i32_0 = arith.constant 0 : i32
    %c0_i32_1 = arith.constant 0 : i32
    return %c0_i32, %c0_i32_0 : i32, i32
  }
  func.func @transform_10(%arg0: i32) -> (i32, i32, i32, i32) {
    %c0_i32 = arith.constant 0 : i32
    %c0_i32_0 = arith.constant 0 : i32
    %c0_i32_1 = arith.constant 0 : i32
    %c0_i32_2 = arith.constant 0 : i32
    %c0_i32_3 = arith.constant 0 : i32
    return %c0_i32, %c0_i32_0, %c0_i32_1, %c0_i32_2 : i32, i32, i32, i32
  }
  func.func @transform_11(%arg0: i32) -> (i32, i32) {
    %c0_i32 = arith.constant 0 : i32
    %c0_i32_0 = arith.constant 0 : i32
    %c0_i32_1 = arith.constant 0 : i32
    return %c0_i32, %c0_i32_0 : i32, i32
  }
  func.func @transform_12(%arg0: i32) -> (i32, i32) {
    %c0_i32 = arith.constant 0 : i32
    %c0_i32_0 = arith.constant 0 : i32
    %c0_i32_1 = arith.constant 0 : i32
    return %c0_i32, %c0_i32_0 : i32, i32
  }
  func.func @transform_13(%arg0: i32) -> (i32, i32, i32) {
    %c0_i32 = arith.constant 0 : i32
    %c0_i32_0 = arith.constant 0 : i32
    %c0_i32_1 = arith.constant 0 : i32
    return %arg0, %c0_i32, %c0_i32_0 : i32, i32, i32
  }
}

</mosaic_0001>

<bundles_post_ra>
// kernel: tpu_custom_call.1
= control target key start
LH: loop header
LB: loop body
LE: loop exit
PB: predicated region body
PF: predicated region fallthrough
CT: control target
= control target key end

     0   :  { %6 = vsyncpa [#allocation3], 0  ;;  %s128_s0 = inlined_call_operand.hbm [shape: f32[8,128], index: 0, kind: input, shape index: {}]   ;;  %s129_s1 = inlined_call_operand.hbm [shape: f32[8,128], index: 1, kind: output, shape index: {}]  }
   0x1   :  { %7 = vsyncpa [#allocation4], 0  ;;  %s91_s6 = smov [#allocation2]   ;;  %s43_s10 = scalar_lea.hbm %s128_s0, 128 }
   0x2   :  { %s14_s7 = sshll.u32 %s91_s6, 4  ;;  %p44_p0 = scmp.ne.s32.totalorder %s128_s0, %s43_s10  ;;  %s15_s7 = int_to_ptr.vmem [resolvable:$true] %s14_s7 }
   0x3   :  { %p47_p1 = scmp.lt.u32.totalorder %s43_s10, %s128_s0 }
   0x5   :  { %p49_p2 = pnand %p47_p1, %p44_p0 }
   0x7   :  { %52 = shalt.err (!%p49_p2)
}
   0x8   :  { %s53_s15 = scalar_lea.vmem %s15_s7, 128  ;;  %p58_p4 = scmp.lt.s32.totalorder %s15_s7, %s15_s7 }
   0x9   :  { %p54_p3 = scmp.ne.s32.totalorder %s15_s7, %s53_s15  ;;  %p59_p5 = scmp.lt.s32.totalorder %s53_s15, %s53_s15 }
   0xb   :  { %p60_p6 = por %p59_p5, %p58_p4 }
   0xd   :  { %p61_p7 = pnand %p60_p6, %p54_p3 }
   0xf   :  { %64 = shalt.err (!%p61_p7)
}
  0x10   :  { %17 = dma.hbm_to_vmem [thread:$0]  %s128_s0, 128, %s15_s7, [#allocation3]  }
  0x11   :  { %87 = dma.done.wait [#allocation3], 128  }
  0x12   :  { %88 = vsyncadd [#allocation3], 4294967168  ;;  %v21_v0 = vld [vmem:[#allocation2] sm:$0xff]  ;;  %s92_s18 = smov 1   ;;  %s93_s19 = smov [#allocation5]  }
  0x13   :  { %22 = vrot.lane.b32.xlu0 %v21_v0, %s92_s18  ;;  %s31_s20 = sshll.u32 %s93_s19, 4  ;;  %s32_s20 = int_to_ptr.vmem [resolvable:$true] %s31_s20 }
  0x14   :  { %s65_s21 = scalar_lea.vmem %s32_s20, 128  ;;  %p70_p9 = scmp.lt.s32.totalorder %s32_s20, %s32_s20 }
  0x15   :  { %p66_p8 = scmp.ne.s32.totalorder %s32_s20, %s65_s21  ;;  %p71_p10 = scmp.lt.s32.totalorder %s65_s21, %s65_s21 }
  0x17   :  { %p72_p11 = por %p71_p10, %p70_p9 }
  0x19   :  { %p73_p12 = pnand %p72_p11, %p66_p8 }
  0x85   :  { %v23_v1 = vpop.permute.xlu0 %22 }
  0x86   :  { %24 = vst [vmem:[#allocation5] sm:$0xff] %v23_v1 }
  0x87   :  { %76 = shalt.err (!%p73_p12)
}
  0x88   :  { %s77_s0 = scalar_lea.hbm %s129_s1, 128 }
  0x89   :  { %p78_p13 = scmp.ne.s32.totalorder %s129_s1, %s77_s0  ;;  %p81_p0 = scmp.lt.u32.totalorder %s77_s0, %s129_s1 }
  0x8b   :  { %p83_p1 = pnand %p81_p0, %p78_p13 }
  0x8d   :  { %86 = shalt.err (!%p83_p1)
}
  0x8e   :  { %34 = dma.vmem_to_hbm [thread:$0]  %s32_s20, 128, %s129_s1, [#allocation4]  }
  0x8f   :  { %89 = dma.done.wait [#allocation4], 128  }
  0x90   :  { %90 = vsyncadd [#allocation4], 4294967168 }
  0x91   :  { %38 = vsyncpa [#allocation3], 1 }
  0x92   :  { %39 = vsyncpa [#allocation4], 1 }

</bundles_post_ra>
